<compile_context>
chip_gen: v6e
topology: v6e:2x2x1
jax: 0.10.0
libtpu: 0.0.40
codegen_flags: <defaults>
</compile_context>

<pallas_src>
import functools

import jax
import jax.numpy as jnp
import numpy as np
from jax import lax
from jax.experimental import pallas as pl
from jax.experimental.pallas import tpu as pltpu


def _pick_bt(N, chi, cho, HW, k):
    """Images packed per grid step.

    Prefer divisors of N that make both the input (Bt*chi) and output (Bt*cho)
    row counts multiples of 8 (full sublane utilization), keep the per-step tap
    stack a few MiB (fits any generation's VMEM, incl. v7x's 64 MiB), and keep
    the grid length >= 2 so the batch axis can be split across v7x's two
    TensorCores.  Falls back to the whole batch (full-dim blocks are always legal).
    """
    cands = [b for b in range(1, N + 1)
             if N % b == 0 and (b * chi) % 8 == 0 and (b * cho) % 8 == 0]
    if not cands:
        return N
    budget = 4 * 1024 * 1024   # bytes for one shifted-tap stack
    ok = [b for b in cands if k * b * max(chi, cho) * HW * 4 <= budget] or [min(cands)]
    for b in sorted(ok, reverse=True):         # prefer fewer, fatter steps ...
        if N // b >= 2:                        # ... but keep >= 2 steps (v7x megacore)
            return b
    return max(ok)


def _global_conv_kernel(x_ref, w_ref, o_ref, *, H, W, k, d, Kin, Kmid):
    """One grid step = Bt packed images.

    x_ref : (Bt*chi, H*W)   activations, channels on sublanes, H*W on lanes
    w_ref : (5, Bt*cho, PW) lane-padded slab:
            [0] wl1 block-diag (.., Kin)    [1] wl2*bn_scale (.., Kmid)
            [2] wr1 block-diag (.., Kin)    [3] wr2*bn_scale (.., Kmid)
            [4] bn shift       (.., 1)
    o_ref : (Bt*cho, H*W)
    """
    HW = H * W
    p = d * (k // 2)

    x = x_ref[...]
    w = w_ref[...]
    wl1, wl2 = w[0, :, :Kin], w[1, :, :Kmid]
    wr1, wr2 = w[2, :, :Kin], w[3, :, :Kmid]
    shift = w[4, :, :1]

    # Hoisted per-tap lane offsets and boundary masks, shared by both paths and
    # by every input channel (the mask depends only on the tap offset).
    pos = lax.broadcasted_iota(jnp.int32, (1, HW), 1)
    pos_w = pos % W
    v_offs, h_offs, v_masks, h_masks = [], [], [], []
    for t in range(k):
        dv = d * t - p
        v_offs.append(dv * W)                       # vertical tap: shift by rows
        h_offs.append(dv)                           # horizontal tap: shift by cols
        v_masks.append(None if dv == 0 else
                       jnp.logical_and(pos + dv * W >= 0, pos + dv * W < HW))
        h_masks.append(None if dv == 0 else
                       jnp.logical_and(pos_w + dv >= 0, pos_w + dv < W))

    def tap_stack(src, offs, masks):
        # src: (rows, HW) -> (k*rows, HW); tap t occupies rows [t*rows,(t+1)*rows)
        # with out[j] = src[j + off_t], zero outside the image.  The shift is an
        # XLU lane rotation (pltpu.roll); the zero boundary is one select per tap
        # applied to the whole block.
        parts = []
        for t, off in enumerate(offs):
            if off == 0:
                parts.append(src)
            else:
                rolled = pltpu.roll(src, (-off) % HW, axis=1)
                parts.append(jnp.where(masks[t], rolled, 0.0))
        return jnp.concatenate(parts, axis=0)

    # Path L: (k,1) conv then (1,k) conv (BN scale pre-folded into wl2).
    a = jnp.dot(wl1, tap_stack(x, v_offs, v_masks),
                preferred_element_type=jnp.float32)
    bl = jnp.dot(wl2, tap_stack(a, h_offs, h_masks),
                 preferred_element_type=jnp.float32)
    # Path R: (1,k) conv then (k,1) conv (BN scale pre-folded into wr2).
    c = jnp.dot(wr1, tap_stack(x, h_offs, h_masks),
                preferred_element_type=jnp.float32)
    br = jnp.dot(wr2, tap_stack(c, v_offs, v_masks),
                 preferred_element_type=jnp.float32)

    y = bl + br + shift                              # BN shift broadcasts over lanes
    o_ref[...] = jnp.maximum(y, 0.0).astype(o_ref.dtype)


def global_conv_forward(x, wl1, wl2, wr1, wr2,
                        bn_gamma, bn_beta, bn_mean, bn_var,
                        *, k=7, d=1, eps=1e-5):
    """Pallas implementation of GlobalConv.forward(x) (inference mode).

    x   : (N, chi, H, W) float32, NCHW.
    wl1 : (cho, chi, k, 1)  gcl[0].weight     wl2 : (cho, cho, 1, k)  gcl[1].weight
    wr1 : (cho, chi, 1, k)  gcr[0].weight     wr2 : (cho, cho, k, 1)  gcr[1].weight
    bn_*: (cho,) BatchNorm2d affine params / running stats.
    """
    N, chi, H, W = x.shape
    cho = wl1.shape[0]
    HW = H * W

    Bt = _pick_bt(N, chi, cho, HW, k)
    grid_n = N // Bt
    rows_in, rows_out = Bt * chi, Bt * cho
    Kin, Kmid = k * rows_in, k * rows_out
    PW = ((max(Kin, Kmid, 1) + 127) // 128) * 128    # lane-padded weight plane width

    # ---- glue: pure reshape only (NCHW is contiguous -> (N*chi, H*W)) ----------
    x2d = x.reshape(N * chi, HW)

    # Fold BN: bn(y) = y*scale + shift; fold `scale` into the second conv of each
    # path so the kernel epilogue is just `+shift, relu`.
    scale = bn_gamma / jnp.sqrt(bn_var + eps)
    shift = bn_beta - bn_mean * scale

    wl1i = wl1[:, :, :, 0]                           # (cho, chi, k)
    wl2i = wl2[:, :, 0, :] * scale[:, None, None]    # (cho, cho, k)
    wr1i = wr1[:, :, 0, :]                           # (cho, chi, k)
    wr2i = wr2[:, :, :, 0] * scale[:, None, None]    # (cho, cho, k)

    def big(w):
        # (cho_, n, k) -> (Bt*cho_, k*Bt*n): block-diagonal over the Bt packed
        # images; columns ordered (tap, image, in_channel) to match tap_stack.
        cho_, n, kk = w.shape
        eye = jnp.eye(Bt, dtype=w.dtype)
        m = jnp.einsum('ab,oit->aotbi', eye, w)      # (Bt, cho_, k, Bt, n)
        return m.reshape(Bt * cho_, kk * Bt * n)

    def plane(a):
        return jnp.pad(a, ((0, rows_out - a.shape[0]), (0, PW - a.shape[1])))

    shift_big = jnp.tile(shift.reshape(cho, 1), (Bt, 1))           # (Bt*cho, 1)
    w_slab = jnp.stack([plane(big(wl1i)), plane(big(wl2i)),
                        plane(big(wr1i)), plane(big(wr2i)),
                        plane(shift_big)], axis=0)                 # (5, Bt*cho, PW)

    kernel = functools.partial(_global_conv_kernel,
                               H=H, W=W, k=k, d=d, Kin=Kin, Kmid=Kmid)

    out2d = pl.pallas_call(
        kernel,
        out_shape=jax.ShapeDtypeStruct((N * cho, HW), jnp.float32),
        grid_spec=pltpu.PrefetchScalarGridSpec(
            num_scalar_prefetch=0,
            grid=(grid_n,),
            in_specs=[
                pl.BlockSpec((rows_in, HW), lambda n: (n, 0)),          # Bt images
                pl.BlockSpec((5, rows_out, PW), lambda n: (0, 0, 0)),   # weights+BN slab
            ],
            out_specs=pl.BlockSpec((rows_out, HW), lambda n: (n, 0)),
        ),
        compiler_params=pltpu.CompilerParams(
            dimension_semantics=("parallel",)),
    )(x2d, w_slab)

    return out2d.reshape(N, cho, H, W)


def _reference(x, wl1, wl2, wr1, wr2, bn_gamma, bn_beta, bn_mean, bn_var,
               *, k=7, d=1, eps=1e-5):
    p = d * (k // 2)
    dn = ("NCHW", "OIHW", "NCHW")

    def conv(inp, w, pad, dil):
        return lax.conv_general_dilated(inp, w, (1, 1), pad,
                                        rhs_dilation=dil, dimension_numbers=dn)

    gcl = conv(conv(x, wl1, [(p, p), (0, 0)], (d, 1)),
               wl2, [(0, 0), (p, p)], (1, d))
    gcr = conv(conv(x, wr1, [(0, 0), (p, p)], (1, d)),
               wr2, [(p, p), (0, 0)], (d, 1))
    y = gcl + gcr
    scale = (bn_gamma / jnp.sqrt(bn_var + eps)).reshape(1, -1, 1, 1)
    shift = (bn_beta - bn_mean * bn_gamma / jnp.sqrt(bn_var + eps)).reshape(1, -1, 1, 1)
    return jnp.maximum(y * scale + shift, 0.0)


if __name__ == "__main__":
    key = jax.random.PRNGKey(0)
    # N=4 so that Bt=2 packs full 8-sublane blocks while the grid stays length 2
    # (keeps both v7x TensorCores busy).
    N, chi, cho, H, W = 4, 4, 4, 16, 16
    k, d = 7, 1

    ks = jax.random.split(key, 9)
    x = jax.random.normal(ks[0], (N, chi, H, W), dtype=jnp.float32)
    # Deterministic synthetic parameters (not a checkpoint).
    wl1 = 0.1 * jax.random.normal(ks[1], (cho, chi, k, 1), dtype=jnp.float32)
    wl2 = 0.1 * jax.random.normal(ks[2], (cho, cho, 1, k), dtype=jnp.float32)
    wr1 = 0.1 * jax.random.normal(ks[3], (cho, chi, 1, k), dtype=jnp.float32)
    wr2 = 0.1 * jax.random.normal(ks[4], (cho, cho, k, 1), dtype=jnp.float32)
    bn_gamma = 1.0 + 0.1 * jax.random.normal(ks[5], (cho,), dtype=jnp.float32)
    bn_beta = 0.1 * jax.random.normal(ks[6], (cho,), dtype=jnp.float32)
    bn_mean = 0.1 * jax.random.normal(ks[7], (cho,), dtype=jnp.float32)
    bn_var = jnp.abs(jax.random.normal(ks[8], (cho,), dtype=jnp.float32)) + 0.5

    out = global_conv_forward(x, wl1, wl2, wr1, wr2,
                              bn_gamma, bn_beta, bn_mean, bn_var, k=k, d=d)
    out = jax.block_until_ready(out)

    ref = _reference(x, wl1, wl2, wr1, wr2,
                     bn_gamma, bn_beta, bn_mean, bn_var, k=k, d=d)
    # Tolerance allows for the MXU's multi-pass f32 rounding in the two chained
    # contractions; structural errors (wrong tap/mask/block-diag mapping) are
    # O(1e-1) and would still be caught.
    np.testing.assert_allclose(np.asarray(out), np.asarray(ref),
                               rtol=5e-3, atol=5e-3)
    print("KERNEL_OK")
</pallas_src>

<mosaic_0001>
module attributes {stable_mosaic.version = 11 : i64} {
  func.func @_global_conv_kernel(%arg0: i32, %arg1: memref<8x256xf32, #tpu.memory_space<vmem>>, %arg2: memref<5x8x128xf32, #tpu.memory_space<vmem>>, %arg3: memref<8x256xf32, #tpu.memory_space<vmem>>) attributes {dimension_semantics = [#tpu.dimension_semantics<parallel>], iteration_bounds = array<i64: 2>, scalar_prefetch = 0 : i64, scratch_operands = 0 : i64, tpu.core_type = #tpu.core_type<tc>, window_params = [{transform_indices = @transform_0, window_bounds = array<i64: 8, 256>}, {pipeline_mode = #tpu.pipeline_mode<synchronous>, transform_indices = @transform_1, window_bounds = array<i64: 5, 8, 128>}, {transform_indices = @transform_2, window_bounds = array<i64: 8, 256>}]} {
    %c0 = arith.constant 0 : index
    %c0_0 = arith.constant 0 : index
    %0 = vector.load %arg1[%c0, %c0_0] : memref<8x256xf32, #tpu.memory_space<vmem>>, vector<8x256xf32>
    %c0_1 = arith.constant 0 : index
    %c0_2 = arith.constant 0 : index
    %c0_3 = arith.constant 0 : index
    %1 = vector.load %arg2[%c0_1, %c0_2, %c0_3] : memref<5x8x128xf32, #tpu.memory_space<vmem>>, vector<5x8x128xf32>
    %2 = vector.extract_strided_slice %1 {offsets = [0, 0, 0], sizes = [1, 8, 56], strides = [1, 1, 1]} : vector<5x8x128xf32> to vector<1x8x56xf32>
    %3 = vector.shape_cast %2 : vector<1x8x56xf32> to vector<8x56xf32>
    %4 = vector.extract_strided_slice %1 {offsets = [1, 0, 0], sizes = [1, 8, 56], strides = [1, 1, 1]} : vector<5x8x128xf32> to vector<1x8x56xf32>
    %5 = vector.shape_cast %4 : vector<1x8x56xf32> to vector<8x56xf32>
    %6 = vector.extract_strided_slice %1 {offsets = [2, 0, 0], sizes = [1, 8, 56], strides = [1, 1, 1]} : vector<5x8x128xf32> to vector<1x8x56xf32>
    %7 = vector.shape_cast %6 : vector<1x8x56xf32> to vector<8x56xf32>
    %8 = vector.extract_strided_slice %1 {offsets = [3, 0, 0], sizes = [1, 8, 56], strides = [1, 1, 1]} : vector<5x8x128xf32> to vector<1x8x56xf32>
    %9 = vector.shape_cast %8 : vector<1x8x56xf32> to vector<8x56xf32>
    %10 = vector.extract_strided_slice %1 {offsets = [4, 0, 0], sizes = [1, 8, 1], strides = [1, 1, 1]} : vector<5x8x128xf32> to vector<1x8x1xf32>
    %11 = vector.shape_cast %10 : vector<1x8x1xf32> to vector<8x1xf32>
    %12 = tpu.iota {dimensions = array<i32: 1>} : vector<1x256xi32>
    %c16_i32 = arith.constant 16 : i32
    %c0_i32 = arith.constant 0 : i32
    %13 = arith.cmpi eq, %c16_i32, %c0_i32 : i32
    %c1_i32 = arith.constant 1 : i32
    %14 = arith.select %13, %c1_i32, %c16_i32 : i32
    %15 = vector.broadcast %14 : i32 to vector<1x256xi32>
    %16 = arith.remsi %12, %15 : vector<1x256xi32>
    %c0_i32_4 = arith.constant 0 : i32
    %17 = vector.broadcast %c0_i32_4 : i32 to vector<1x256xi32>
    %18 = arith.cmpi ne, %16, %17 : vector<1x256xi32>
    %c0_i32_5 = arith.constant 0 : i32
    %19 = vector.broadcast %c0_i32_5 : i32 to vector<1x256xi32>
    %20 = arith.cmpi slt, %16, %19 : vector<1x256xi32>
    %c0_i32_6 = arith.constant 0 : i32
    %21 = arith.cmpi slt, %14, %c0_i32_6 : i32
    %22 = vector.broadcast %21 : i1 to vector<1x256xi1>
    %23 = vector.broadcast %22 : vector<1x256xi1> to vector<1x256xi1>
    %24 = arith.xori %20, %23 : vector<1x256xi1>
    %25 = arith.andi %24, %18 : vector<1x256xi1>
    %26 = vector.broadcast %14 : i32 to vector<1x256xi32>
    %27 = arith.addi %16, %26 : vector<1x256xi32>
    %28 = arith.select %25, %27, %16 : vector<1x256xi1>, vector<1x256xi32>
    %c-48_i32 = arith.constant -48 : i32
    %29 = vector.broadcast %c-48_i32 : i32 to vector<1x256xi32>
    %30 = arith.addi %12, %29 : vector<1x256xi32>
    %c0_i32_7 = arith.constant 0 : i32
    %31 = vector.broadcast %c0_i32_7 : i32 to vector<1x256xi32>
    %32 = arith.cmpi sge, %30, %31 : vector<1x256xi32>
    %c-48_i32_8 = arith.constant -48 : i32
    %33 = vector.broadcast %c-48_i32_8 : i32 to vector<1x256xi32>
    %34 = arith.addi %12, %33 : vector<1x256xi32>
    %c256_i32 = arith.constant 256 : i32
    %35 = vector.broadcast %c256_i32 : i32 to vector<1x256xi32>
    %36 = arith.cmpi slt, %34, %35 : vector<1x256xi32>
    %37 = arith.andi %32, %36 : vector<1x256xi1>
    %c-3_i32 = arith.constant -3 : i32
    %38 = vector.broadcast %c-3_i32 : i32 to vector<1x256xi32>
    %39 = arith.addi %28, %38 : vector<1x256xi32>
    %c0_i32_9 = arith.constant 0 : i32
    %40 = vector.broadcast %c0_i32_9 : i32 to vector<1x256xi32>
    %41 = arith.cmpi sge, %39, %40 : vector<1x256xi32>
    %c-3_i32_10 = arith.constant -3 : i32
    %42 = vector.broadcast %c-3_i32_10 : i32 to vector<1x256xi32>
    %43 = arith.addi %28, %42 : vector<1x256xi32>
    %c16_i32_11 = arith.constant 16 : i32
    %44 = vector.broadcast %c16_i32_11 : i32 to vector<1x256xi32>
    %45 = arith.cmpi slt, %43, %44 : vector<1x256xi32>
    %46 = arith.andi %41, %45 : vector<1x256xi1>
    %c-32_i32 = arith.constant -32 : i32
    %47 = vector.broadcast %c-32_i32 : i32 to vector<1x256xi32>
    %48 = arith.addi %12, %47 : vector<1x256xi32>
    %c0_i32_12 = arith.constant 0 : i32
    %49 = vector.broadcast %c0_i32_12 : i32 to vector<1x256xi32>
    %50 = arith.cmpi sge, %48, %49 : vector<1x256xi32>
    %c-32_i32_13 = arith.constant -32 : i32
    %51 = vector.broadcast %c-32_i32_13 : i32 to vector<1x256xi32>
    %52 = arith.addi %12, %51 : vector<1x256xi32>
    %c256_i32_14 = arith.constant 256 : i32
    %53 = vector.broadcast %c256_i32_14 : i32 to vector<1x256xi32>
    %54 = arith.cmpi slt, %52, %53 : vector<1x256xi32>
    %55 = arith.andi %50, %54 : vector<1x256xi1>
    %c-2_i32 = arith.constant -2 : i32
    %56 = vector.broadcast %c-2_i32 : i32 to vector<1x256xi32>
    %57 = arith.addi %28, %56 : vector<1x256xi32>
    %c0_i32_15 = arith.constant 0 : i32
    %58 = vector.broadcast %c0_i32_15 : i32 to vector<1x256xi32>
    %59 = arith.cmpi sge, %57, %58 : vector<1x256xi32>
    %c-2_i32_16 = arith.constant -2 : i32
    %60 = vector.broadcast %c-2_i32_16 : i32 to vector<1x256xi32>
    %61 = arith.addi %28, %60 : vector<1x256xi32>
    %c16_i32_17 = arith.constant 16 : i32
    %62 = vector.broadcast %c16_i32_17 : i32 to vector<1x256xi32>
    %63 = arith.cmpi slt, %61, %62 : vector<1x256xi32>
    %64 = arith.andi %59, %63 : vector<1x256xi1>
    %c-16_i32 = arith.constant -16 : i32
    %65 = vector.broadcast %c-16_i32 : i32 to vector<1x256xi32>
    %66 = arith.addi %12, %65 : vector<1x256xi32>
    %c0_i32_18 = arith.constant 0 : i32
    %67 = vector.broadcast %c0_i32_18 : i32 to vector<1x256xi32>
    %68 = arith.cmpi sge, %66, %67 : vector<1x256xi32>
    %c-16_i32_19 = arith.constant -16 : i32
    %69 = vector.broadcast %c-16_i32_19 : i32 to vector<1x256xi32>
    %70 = arith.addi %12, %69 : vector<1x256xi32>
    %c256_i32_20 = arith.constant 256 : i32
    %71 = vector.broadcast %c256_i32_20 : i32 to vector<1x256xi32>
    %72 = arith.cmpi slt, %70, %71 : vector<1x256xi32>
    %73 = arith.andi %68, %72 : vector<1x256xi1>
    %c-1_i32 = arith.constant -1 : i32
    %74 = vector.broadcast %c-1_i32 : i32 to vector<1x256xi32>
    %75 = arith.addi %28, %74 : vector<1x256xi32>
    %c0_i32_21 = arith.constant 0 : i32
    %76 = vector.broadcast %c0_i32_21 : i32 to vector<1x256xi32>
    %77 = arith.cmpi sge, %75, %76 : vector<1x256xi32>
    %c-1_i32_22 = arith.constant -1 : i32
    %78 = vector.broadcast %c-1_i32_22 : i32 to vector<1x256xi32>
    %79 = arith.addi %28, %78 : vector<1x256xi32>
    %c16_i32_23 = arith.constant 16 : i32
    %80 = vector.broadcast %c16_i32_23 : i32 to vector<1x256xi32>
    %81 = arith.cmpi slt, %79, %80 : vector<1x256xi32>
    %82 = arith.andi %77, %81 : vector<1x256xi1>
    %c16_i32_24 = arith.constant 16 : i32
    %83 = vector.broadcast %c16_i32_24 : i32 to vector<1x256xi32>
    %84 = arith.addi %12, %83 : vector<1x256xi32>
    %c0_i32_25 = arith.constant 0 : i32
    %85 = vector.broadcast %c0_i32_25 : i32 to vector<1x256xi32>
    %86 = arith.cmpi sge, %84, %85 : vector<1x256xi32>
    %c16_i32_26 = arith.constant 16 : i32
    %87 = vector.broadcast %c16_i32_26 : i32 to vector<1x256xi32>
    %88 = arith.addi %12, %87 : vector<1x256xi32>
    %c256_i32_27 = arith.constant 256 : i32
    %89 = vector.broadcast %c256_i32_27 : i32 to vector<1x256xi32>
    %90 = arith.cmpi slt, %88, %89 : vector<1x256xi32>
    %91 = arith.andi %86, %90 : vector<1x256xi1>
    %c1_i32_28 = arith.constant 1 : i32
    %92 = vector.broadcast %c1_i32_28 : i32 to vector<1x256xi32>
    %93 = arith.addi %28, %92 : vector<1x256xi32>
    %c0_i32_29 = arith.constant 0 : i32
    %94 = vector.broadcast %c0_i32_29 : i32 to vector<1x256xi32>
    %95 = arith.cmpi sge, %93, %94 : vector<1x256xi32>
    %c1_i32_30 = arith.constant 1 : i32
    %96 = vector.broadcast %c1_i32_30 : i32 to vector<1x256xi32>
    %97 = arith.addi %28, %96 : vector<1x256xi32>
    %c16_i32_31 = arith.constant 16 : i32
    %98 = vector.broadcast %c16_i32_31 : i32 to vector<1x256xi32>
    %99 = arith.cmpi slt, %97, %98 : vector<1x256xi32>
    %100 = arith.andi %95, %99 : vector<1x256xi1>
    %c32_i32 = arith.constant 32 : i32
    %101 = vector.broadcast %c32_i32 : i32 to vector<1x256xi32>
    %102 = arith.addi %12, %101 : vector<1x256xi32>
    %c0_i32_32 = arith.constant 0 : i32
    %103 = vector.broadcast %c0_i32_32 : i32 to vector<1x256xi32>
    %104 = arith.cmpi sge, %102, %103 : vector<1x256xi32>
    %c32_i32_33 = arith.constant 32 : i32
    %105 = vector.broadcast %c32_i32_33 : i32 to vector<1x256xi32>
    %106 = arith.addi %12, %105 : vector<1x256xi32>
    %c256_i32_34 = arith.constant 256 : i32
    %107 = vector.broadcast %c256_i32_34 : i32 to vector<1x256xi32>
    %108 = arith.cmpi slt, %106, %107 : vector<1x256xi32>
    %109 = arith.andi %104, %108 : vector<1x256xi1>
    %c2_i32 = arith.constant 2 : i32
    %110 = vector.broadcast %c2_i32 : i32 to vector<1x256xi32>
    %111 = arith.addi %28, %110 : vector<1x256xi32>
    %c0_i32_35 = arith.constant 0 : i32
    %112 = vector.broadcast %c0_i32_35 : i32 to vector<1x256xi32>
    %113 = arith.cmpi sge, %111, %112 : vector<1x256xi32>
    %c2_i32_36 = arith.constant 2 : i32
    %114 = vector.broadcast %c2_i32_36 : i32 to vector<1x256xi32>
    %115 = arith.addi %28, %114 : vector<1x256xi32>
    %c16_i32_37 = arith.constant 16 : i32
    %116 = vector.broadcast %c16_i32_37 : i32 to vector<1x256xi32>
    %117 = arith.cmpi slt, %115, %116 : vector<1x256xi32>
    %118 = arith.andi %113, %117 : vector<1x256xi1>
    %c48_i32 = arith.constant 48 : i32
    %119 = vector.broadcast %c48_i32 : i32 to vector<1x256xi32>
    %120 = arith.addi %12, %119 : vector<1x256xi32>
    %c0_i32_38 = arith.constant 0 : i32
    %121 = vector.broadcast %c0_i32_38 : i32 to vector<1x256xi32>
    %122 = arith.cmpi sge, %120, %121 : vector<1x256xi32>
    %c48_i32_39 = arith.constant 48 : i32
    %123 = vector.broadcast %c48_i32_39 : i32 to vector<1x256xi32>
    %124 = arith.addi %12, %123 : vector<1x256xi32>
    %c256_i32_40 = arith.constant 256 : i32
    %125 = vector.broadcast %c256_i32_40 : i32 to vector<1x256xi32>
    %126 = arith.cmpi slt, %124, %125 : vector<1x256xi32>
    %127 = arith.andi %122, %126 : vector<1x256xi1>
    %c3_i32 = arith.constant 3 : i32
    %128 = vector.broadcast %c3_i32 : i32 to vector<1x256xi32>
    %129 = arith.addi %28, %128 : vector<1x256xi32>
    %c0_i32_41 = arith.constant 0 : i32
    %130 = vector.broadcast %c0_i32_41 : i32 to vector<1x256xi32>
    %131 = arith.cmpi sge, %129, %130 : vector<1x256xi32>
    %c3_i32_42 = arith.constant 3 : i32
    %132 = vector.broadcast %c3_i32_42 : i32 to vector<1x256xi32>
    %133 = arith.addi %28, %132 : vector<1x256xi32>
    %c16_i32_43 = arith.constant 16 : i32
    %134 = vector.broadcast %c16_i32_43 : i32 to vector<1x256xi32>
    %135 = arith.cmpi slt, %133, %134 : vector<1x256xi32>
    %136 = arith.andi %131, %135 : vector<1x256xi1>
    %c48_i32_44 = arith.constant 48 : i32
    %137 = tpu.dynamic_rotate %0 by %c48_i32_44 dim 1 : vector<8x256xf32>, i32 -> vector<8x256xf32>
    %cst = arith.constant 0.000000e+00 : f32
    %138 = vector.shape_cast %37 : vector<1x256xi1> to vector<1x256xi1>
    %139 = vector.broadcast %138 : vector<1x256xi1> to vector<8x256xi1>
    %140 = vector.broadcast %cst : f32 to vector<8x256xf32>
    %141 = arith.select %139, %137, %140 : vector<8x256xi1>, vector<8x256xf32>
    %c32_i32_45 = arith.constant 32 : i32
    %142 = tpu.dynamic_rotate %0 by %c32_i32_45 dim 1 : vector<8x256xf32>, i32 -> vector<8x256xf32>
    %cst_46 = arith.constant 0.000000e+00 : f32
    %143 = vector.shape_cast %55 : vector<1x256xi1> to vector<1x256xi1>
    %144 = vector.broadcast %143 : vector<1x256xi1> to vector<8x256xi1>
    %145 = vector.broadcast %cst_46 : f32 to vector<8x256xf32>
    %146 = arith.select %144, %142, %145 : vector<8x256xi1>, vector<8x256xf32>
    %c16_i32_47 = arith.constant 16 : i32
    %147 = tpu.dynamic_rotate %0 by %c16_i32_47 dim 1 : vector<8x256xf32>, i32 -> vector<8x256xf32>
    %cst_48 = arith.constant 0.000000e+00 : f32
    %148 = vector.shape_cast %73 : vector<1x256xi1> to vector<1x256xi1>
    %149 = vector.broadcast %148 : vector<1x256xi1> to vector<8x256xi1>
    %150 = vector.broadcast %cst_48 : f32 to vector<8x256xf32>
    %151 = arith.select %149, %147, %150 : vector<8x256xi1>, vector<8x256xf32>
    %c240_i32 = arith.constant 240 : i32
    %152 = tpu.dynamic_rotate %0 by %c240_i32 dim 1 : vector<8x256xf32>, i32 -> vector<8x256xf32>
    %cst_49 = arith.constant 0.000000e+00 : f32
    %153 = vector.shape_cast %91 : vector<1x256xi1> to vector<1x256xi1>
    %154 = vector.broadcast %153 : vector<1x256xi1> to vector<8x256xi1>
    %155 = vector.broadcast %cst_49 : f32 to vector<8x256xf32>
    %156 = arith.select %154, %152, %155 : vector<8x256xi1>, vector<8x256xf32>
    %c224_i32 = arith.constant 224 : i32
    %157 = tpu.dynamic_rotate %0 by %c224_i32 dim 1 : vector<8x256xf32>, i32 -> vector<8x256xf32>
    %cst_50 = arith.constant 0.000000e+00 : f32
    %158 = vector.shape_cast %109 : vector<1x256xi1> to vector<1x256xi1>
    %159 = vector.broadcast %158 : vector<1x256xi1> to vector<8x256xi1>
    %160 = vector.broadcast %cst_50 : f32 to vector<8x256xf32>
    %161 = arith.select %159, %157, %160 : vector<8x256xi1>, vector<8x256xf32>
    %c208_i32 = arith.constant 208 : i32
    %162 = tpu.dynamic_rotate %0 by %c208_i32 dim 1 : vector<8x256xf32>, i32 -> vector<8x256xf32>
    %cst_51 = arith.constant 0.000000e+00 : f32
    %163 = vector.shape_cast %127 : vector<1x256xi1> to vector<1x256xi1>
    %164 = vector.broadcast %163 : vector<1x256xi1> to vector<8x256xi1>
    %165 = vector.broadcast %cst_51 : f32 to vector<8x256xf32>
    %166 = arith.select %164, %162, %165 : vector<8x256xi1>, vector<8x256xf32>
    %167 = tpu.concatenate %141, %146, %151, %0, %156, %161, %166 in 0 : vector<8x256xf32>, vector<8x256xf32>, vector<8x256xf32>, vector<8x256xf32>, vector<8x256xf32>, vector<8x256xf32>, vector<8x256xf32> -> vector<56x256xf32>
    %cst_52 = arith.constant dense<0.000000e+00> : vector<8x256xf32>
    %168 = tpu.matmul %3, %167, %cst_52 {dimension_numbers = #tpu.dot_dimension_numbers<[1], [0], [0], [1], [0, 0, 1, 1], [], []>} : vector<8x56xf32>, vector<56x256xf32>, vector<8x256xf32> -> vector<8x256xf32>
    %c3_i32_53 = arith.constant 3 : i32
    %169 = tpu.dynamic_rotate %168 by %c3_i32_53 dim 1 : vector<8x256xf32>, i32 -> vector<8x256xf32>
    %cst_54 = arith.constant 0.000000e+00 : f32
    %170 = vector.shape_cast %46 : vector<1x256xi1> to vector<1x256xi1>
    %171 = vector.broadcast %170 : vector<1x256xi1> to vector<8x256xi1>
    %172 = vector.broadcast %cst_54 : f32 to vector<8x256xf32>
    %173 = arith.select %171, %169, %172 : vector<8x256xi1>, vector<8x256xf32>
    %c2_i32_55 = arith.constant 2 : i32
    %174 = tpu.dynamic_rotate %168 by %c2_i32_55 dim 1 : vector<8x256xf32>, i32 -> vector<8x256xf32>
    %cst_56 = arith.constant 0.000000e+00 : f32
    %175 = vector.shape_cast %64 : vector<1x256xi1> to vector<1x256xi1>
    %176 = vector.broadcast %175 : vector<1x256xi1> to vector<8x256xi1>
    %177 = vector.broadcast %cst_56 : f32 to vector<8x256xf32>
    %178 = arith.select %176, %174, %177 : vector<8x256xi1>, vector<8x256xf32>
    %c1_i32_57 = arith.constant 1 : i32
    %179 = tpu.dynamic_rotate %168 by %c1_i32_57 dim 1 : vector<8x256xf32>, i32 -> vector<8x256xf32>
    %cst_58 = arith.constant 0.000000e+00 : f32
    %180 = vector.shape_cast %82 : vector<1x256xi1> to vector<1x256xi1>
    %181 = vector.broadcast %180 : vector<1x256xi1> to vector<8x256xi1>
    %182 = vector.broadcast %cst_58 : f32 to vector<8x256xf32>
    %183 = arith.select %181, %179, %182 : vector<8x256xi1>, vector<8x256xf32>
    %c255_i32 = arith.constant 255 : i32
    %184 = tpu.dynamic_rotate %168 by %c255_i32 dim 1 : vector<8x256xf32>, i32 -> vector<8x256xf32>
    %cst_59 = arith.constant 0.000000e+00 : f32
    %185 = vector.shape_cast %100 : vector<1x256xi1> to vector<1x256xi1>
    %186 = vector.broadcast %185 : vector<1x256xi1> to vector<8x256xi1>
    %187 = vector.broadcast %cst_59 : f32 to vector<8x256xf32>
    %188 = arith.select %186, %184, %187 : vector<8x256xi1>, vector<8x256xf32>
    %c254_i32 = arith.constant 254 : i32
    %189 = tpu.dynamic_rotate %168 by %c254_i32 dim 1 : vector<8x256xf32>, i32 -> vector<8x256xf32>
    %cst_60 = arith.constant 0.000000e+00 : f32
    %190 = vector.shape_cast %118 : vector<1x256xi1> to vector<1x256xi1>
    %191 = vector.broadcast %190 : vector<1x256xi1> to vector<8x256xi1>
    %192 = vector.broadcast %cst_60 : f32 to vector<8x256xf32>
    %193 = arith.select %191, %189, %192 : vector<8x256xi1>, vector<8x256xf32>
    %c253_i32 = arith.constant 253 : i32
    %194 = tpu.dynamic_rotate %168 by %c253_i32 dim 1 : vector<8x256xf32>, i32 -> vector<8x256xf32>
    %cst_61 = arith.constant 0.000000e+00 : f32
    %195 = vector.shape_cast %136 : vector<1x256xi1> to vector<1x256xi1>
    %196 = vector.broadcast %195 : vector<1x256xi1> to vector<8x256xi1>
    %197 = vector.broadcast %cst_61 : f32 to vector<8x256xf32>
    %198 = arith.select %196, %194, %197 : vector<8x256xi1>, vector<8x256xf32>
    %199 = tpu.concatenate %173, %178, %183, %168, %188, %193, %198 in 0 : vector<8x256xf32>, vector<8x256xf32>, vector<8x256xf32>, vector<8x256xf32>, vector<8x256xf32>, vector<8x256xf32>, vector<8x256xf32> -> vector<56x256xf32>
    %cst_62 = arith.constant dense<0.000000e+00> : vector<8x256xf32>
    %200 = tpu.matmul %5, %199, %cst_62 {dimension_numbers = #tpu.dot_dimension_numbers<[1], [0], [0], [1], [0, 0, 1, 1], [], []>} : vector<8x56xf32>, vector<56x256xf32>, vector<8x256xf32> -> vector<8x256xf32>
    %c3_i32_63 = arith.constant 3 : i32
    %201 = tpu.dynamic_rotate %0 by %c3_i32_63 dim 1 : vector<8x256xf32>, i32 -> vector<8x256xf32>
    %cst_64 = arith.constant 0.000000e+00 : f32
    %202 = vector.shape_cast %46 : vector<1x256xi1> to vector<1x256xi1>
    %203 = vector.broadcast %202 : vector<1x256xi1> to vector<8x256xi1>
    %204 = vector.broadcast %cst_64 : f32 to vector<8x256xf32>
    %205 = arith.select %203, %201, %204 : vector<8x256xi1>, vector<8x256xf32>
    %c2_i32_65 = arith.constant 2 : i32
    %206 = tpu.dynamic_rotate %0 by %c2_i32_65 dim 1 : vector<8x256xf32>, i32 -> vector<8x256xf32>
    %cst_66 = arith.constant 0.000000e+00 : f32
    %207 = vector.shape_cast %64 : vector<1x256xi1> to vector<1x256xi1>
    %208 = vector.broadcast %207 : vector<1x256xi1> to vector<8x256xi1>
    %209 = vector.broadcast %cst_66 : f32 to vector<8x256xf32>
    %210 = arith.select %208, %206, %209 : vector<8x256xi1>, vector<8x256xf32>
    %c1_i32_67 = arith.constant 1 : i32
    %211 = tpu.dynamic_rotate %0 by %c1_i32_67 dim 1 : vector<8x256xf32>, i32 -> vector<8x256xf32>
    %cst_68 = arith.constant 0.000000e+00 : f32
    %212 = vector.shape_cast %82 : vector<1x256xi1> to vector<1x256xi1>
    %213 = vector.broadcast %212 : vector<1x256xi1> to vector<8x256xi1>
    %214 = vector.broadcast %cst_68 : f32 to vector<8x256xf32>
    %215 = arith.select %213, %211, %214 : vector<8x256xi1>, vector<8x256xf32>
    %c255_i32_69 = arith.constant 255 : i32
    %216 = tpu.dynamic_rotate %0 by %c255_i32_69 dim 1 : vector<8x256xf32>, i32 -> vector<8x256xf32>
    %cst_70 = arith.constant 0.000000e+00 : f32
    %217 = vector.shape_cast %100 : vector<1x256xi1> to vector<1x256xi1>
    %218 = vector.broadcast %217 : vector<1x256xi1> to vector<8x256xi1>
    %219 = vector.broadcast %cst_70 : f32 to vector<8x256xf32>
    %220 = arith.select %218, %216, %219 : vector<8x256xi1>, vector<8x256xf32>
    %c254_i32_71 = arith.constant 254 : i32
    %221 = tpu.dynamic_rotate %0 by %c254_i32_71 dim 1 : vector<8x256xf32>, i32 -> vector<8x256xf32>
    %cst_72 = arith.constant 0.000000e+00 : f32
    %222 = vector.shape_cast %118 : vector<1x256xi1> to vector<1x256xi1>
    %223 = vector.broadcast %222 : vector<1x256xi1> to vector<8x256xi1>
    %224 = vector.broadcast %cst_72 : f32 to vector<8x256xf32>
    %225 = arith.select %223, %221, %224 : vector<8x256xi1>, vector<8x256xf32>
    %c253_i32_73 = arith.constant 253 : i32
    %226 = tpu.dynamic_rotate %0 by %c253_i32_73 dim 1 : vector<8x256xf32>, i32 -> vector<8x256xf32>
    %cst_74 = arith.constant 0.000000e+00 : f32
    %227 = vector.shape_cast %136 : vector<1x256xi1> to vector<1x256xi1>
    %228 = vector.broadcast %227 : vector<1x256xi1> to vector<8x256xi1>
    %229 = vector.broadcast %cst_74 : f32 to vector<8x256xf32>
    %230 = arith.select %228, %226, %229 : vector<8x256xi1>, vector<8x256xf32>
    %231 = tpu.concatenate %205, %210, %215, %0, %220, %225, %230 in 0 : vector<8x256xf32>, vector<8x256xf32>, vector<8x256xf32>, vector<8x256xf32>, vector<8x256xf32>, vector<8x256xf32>, vector<8x256xf32> -> vector<56x256xf32>
    %cst_75 = arith.constant dense<0.000000e+00> : vector<8x256xf32>
    %232 = tpu.matmul %7, %231, %cst_75 {dimension_numbers = #tpu.dot_dimension_numbers<[1], [0], [0], [1], [0, 0, 1, 1], [], []>} : vector<8x56xf32>, vector<56x256xf32>, vector<8x256xf32> -> vector<8x256xf32>
    %c48_i32_76 = arith.constant 48 : i32
    %233 = tpu.dynamic_rotate %232 by %c48_i32_76 dim 1 : vector<8x256xf32>, i32 -> vector<8x256xf32>
    %cst_77 = arith.constant 0.000000e+00 : f32
    %234 = vector.shape_cast %37 : vector<1x256xi1> to vector<1x256xi1>
    %235 = vector.broadcast %234 : vector<1x256xi1> to vector<8x256xi1>
    %236 = vector.broadcast %cst_77 : f32 to vector<8x256xf32>
    %237 = arith.select %235, %233, %236 : vector<8x256xi1>, vector<8x256xf32>
    %c32_i32_78 = arith.constant 32 : i32
    %238 = tpu.dynamic_rotate %232 by %c32_i32_78 dim 1 : vector<8x256xf32>, i32 -> vector<8x256xf32>
    %cst_79 = arith.constant 0.000000e+00 : f32
    %239 = vector.shape_cast %55 : vector<1x256xi1> to vector<1x256xi1>
    %240 = vector.broadcast %239 : vector<1x256xi1> to vector<8x256xi1>
    %241 = vector.broadcast %cst_79 : f32 to vector<8x256xf32>
    %242 = arith.select %240, %238, %241 : vector<8x256xi1>, vector<8x256xf32>
    %c16_i32_80 = arith.constant 16 : i32
    %243 = tpu.dynamic_rotate %232 by %c16_i32_80 dim 1 : vector<8x256xf32>, i32 -> vector<8x256xf32>
    %cst_81 = arith.constant 0.000000e+00 : f32
    %244 = vector.shape_cast %73 : vector<1x256xi1> to vector<1x256xi1>
    %245 = vector.broadcast %244 : vector<1x256xi1> to vector<8x256xi1>
    %246 = vector.broadcast %cst_81 : f32 to vector<8x256xf32>
    %247 = arith.select %245, %243, %246 : vector<8x256xi1>, vector<8x256xf32>
    %c240_i32_82 = arith.constant 240 : i32
    %248 = tpu.dynamic_rotate %232 by %c240_i32_82 dim 1 : vector<8x256xf32>, i32 -> vector<8x256xf32>
    %cst_83 = arith.constant 0.000000e+00 : f32
    %249 = vector.shape_cast %91 : vector<1x256xi1> to vector<1x256xi1>
    %250 = vector.broadcast %249 : vector<1x256xi1> to vector<8x256xi1>
    %251 = vector.broadcast %cst_83 : f32 to vector<8x256xf32>
    %252 = arith.select %250, %248, %251 : vector<8x256xi1>, vector<8x256xf32>
    %c224_i32_84 = arith.constant 224 : i32
    %253 = tpu.dynamic_rotate %232 by %c224_i32_84 dim 1 : vector<8x256xf32>, i32 -> vector<8x256xf32>
    %cst_85 = arith.constant 0.000000e+00 : f32
    %254 = vector.shape_cast %109 : vector<1x256xi1> to vector<1x256xi1>
    %255 = vector.broadcast %254 : vector<1x256xi1> to vector<8x256xi1>
    %256 = vector.broadcast %cst_85 : f32 to vector<8x256xf32>
    %257 = arith.select %255, %253, %256 : vector<8x256xi1>, vector<8x256xf32>
    %c208_i32_86 = arith.constant 208 : i32
    %258 = tpu.dynamic_rotate %232 by %c208_i32_86 dim 1 : vector<8x256xf32>, i32 -> vector<8x256xf32>
    %cst_87 = arith.constant 0.000000e+00 : f32
    %259 = vector.shape_cast %127 : vector<1x256xi1> to vector<1x256xi1>
    %260 = vector.broadcast %259 : vector<1x256xi1> to vector<8x256xi1>
    %261 = vector.broadcast %cst_87 : f32 to vector<8x256xf32>
    %262 = arith.select %260, %258, %261 : vector<8x256xi1>, vector<8x256xf32>
    %263 = tpu.concatenate %237, %242, %247, %232, %252, %257, %262 in 0 : vector<8x256xf32>, vector<8x256xf32>, vector<8x256xf32>, vector<8x256xf32>, vector<8x256xf32>, vector<8x256xf32>, vector<8x256xf32> -> vector<56x256xf32>
    %cst_88 = arith.constant dense<0.000000e+00> : vector<8x256xf32>
    %264 = tpu.matmul %9, %263, %cst_88 {dimension_numbers = #tpu.dot_dimension_numbers<[1], [0], [0], [1], [0, 0, 1, 1], [], []>} : vector<8x56xf32>, vector<56x256xf32>, vector<8x256xf32> -> vector<8x256xf32>
    %265 = arith.addf %200, %264 : vector<8x256xf32>
    %266 = vector.broadcast %11 : vector<8x1xf32> to vector<8x256xf32>
    %267 = arith.addf %265, %266 : vector<8x256xf32>
    %cst_89 = arith.constant 0.000000e+00 : f32
    %268 = vector.broadcast %cst_89 : f32 to vector<8x256xf32>
    %269 = arith.maximumf %267, %268 : vector<8x256xf32>
    %c0_90 = arith.constant 0 : index
    %c0_91 = arith.constant 0 : index
    %270 = vector.load %arg3[%c0_90, %c0_91] : memref<8x256xf32, #tpu.memory_space<vmem>>, vector<8x256xf32>
    tpu.vector_store %arg3[%c0_90, %c0_91], %269 {strides = array<i32>} : memref<8x256xf32, #tpu.memory_space<vmem>>, vector<8x256xf32>,
    return
  }
  func.func @transform_0(%arg0: i32) -> (i32, i32) {
    %c0_i32 = arith.constant 0 : i32
    %c0_i32_0 = arith.constant 0 : i32
    return %arg0, %c0_i32 : i32, i32
  }
  func.func @transform_1(%arg0: i32) -> (i32, i32, i32) {
    %c0_i32 = arith.constant 0 : i32
    %c0_i32_0 = arith.constant 0 : i32
    %c0_i32_1 = arith.constant 0 : i32
    %c0_i32_2 = arith.constant 0 : i32
    return %c0_i32, %c0_i32_0, %c0_i32_1 : i32, i32, i32
  }
  func.func @transform_2(%arg0: i32) -> (i32, i32) {
    %c0_i32 = arith.constant 0 : i32
    %c0_i32_0 = arith.constant 0 : i32
    return %arg0, %c0_i32 : i32, i32
  }
}

</mosaic_0001>

<bundles_post_ra>
// kernel: tpu_custom_call.1
= control target key start
LH: loop header
LB: loop body
LE: loop exit
PB: predicated region body
PF: predicated region fallthrough
CT: control target
= control target key end

     0   :  { %7 = vsyncpa [#allocation3], 0  ;;  %s1780_s0 = inlined_call_operand.hbm [shape: f32[16,256], index: 0, kind: input, shape index: {}]   ;;  %s1781_s1 = inlined_call_operand.hbm [shape: f32[5,8,128], index: 1, kind: input, shape index: {}]   ;;  %s1782_s2 = inlined_call_operand.hbm [shape: f32[16,256], index: 2, kind: output, shape index: {}]  }
   0x1   :  { %9 = vsyncpa [#allocation3 + $0x1], 0 }
   0x2   :  { %10 = vsyncpa [#allocation6], 0 }
   0x3   :  { %11 = vsyncpa [#allocation4], 0 }
   0x4   :  { %13 = vsyncpa [#allocation4 + $0x1], 0  ;;  %s1250_s9 = smov 0   ;;  %s1252_s10 = smov 0  }
   0x5   :  { %s1254_s11 = smov 0   ;;  %s1256_s12 = smov 0  }
   0x6 LB: > { %s1271_s13 = sadd.s32 4294967295, %s1214_s12   ;;  %s960_s14 = sadd.s32 4294967294, %s1214_s12   ;;  %s1214_s12 = sphi %s1256_s12, %s1840_s12   ;;  %s1210_s11 = sphi %s1254_s11, %s1839_s11   ;;  %s1206_s10 = sphi %s1252_s10, %s1838_s10   ;;  %s1202_s9 = sphi %s1250_s9, %s1837_s9  }
   0x7   : > { %p39_p0 = scmp.ne.s32.totalorder %s1206_s10, %s1202_s9  ;;  %p1783_p1 = scmp.eq.s32.totalorder %s1271_s13, 0 }
   0x8   : > { %p90_p3 = scmp.eq.s32.totalorder %s960_s14, 1  ;;  %p961_p5 = scmp.ge.s32.totalorder %s1214_s12, 1 }
   0x9   : > { %p1280_p4 = por %p1783_p1, %p39_p0  ;;  %p97_p7 = scmp.lt.s32.totalorder %s1214_s12, 3 }
   0xa   : > { %p1285_p6 = por %p90_p3, %p39_p0  ;;  %s1216_s18 = smov [#allocation5]  }
   0xb   : > { %s1802_s15 = scalar_select %p1280_p4, 1, 0 }
   0xc   : > { %s1803_s16 = scalar_select %p1285_p6, 1, 0 }
   0xd   : > { %p1290_p8 = pnand %p961_p5, %p97_p7  ;;  %s109_s19 = sshll.u32 %s1216_s18, 4  ;;  %s110_s19 = int_to_ptr.vmem [resolvable:$true] %s109_s19 }
   0xe   : > { %s1304_s21 = sadd.s32 1, %s1214_s12   ;;  %s26_s22 = sadd.s32 1, %s1210_s11 }
   0xf   : > { %s1804_s17 = scalar_select %p1290_p8, 1, 0 }
  0x10   : > { %p1026_p9 = pneg %p1290_p8  ;;  %s23_s23 = ssub.s32 %s1214_s12, %s1304_s21 }
  0x11   : > { %s1103_s24 = scalar_lea.vmem %s110_s19, 640  ;;  %p1111_p5 = scmp.lt.s32.totalorder %s110_s19, %s110_s19 }
  0x12   : > { %p1299_p11 = pnand %p1026_p9, %p1783_p1  ;;  %p1104_p13 = scmp.ne.s32.totalorder %s110_s19, %s1103_s24 }
  0x13   : > { %p1112_p7 = scmp.lt.s32.totalorder %s1103_s24, %s1103_s24 }
  0x14   : > { %p1094_p12 = pneg %p1299_p11 }
  0x15   : > { %p1113_p10 = por %p1112_p7, %p1111_p5 }
  0x16   : > { %p1106_p0 = pnand %p1104_p13, %p1094_p12 }
  0x18   : > { %p1107_p3 = pneg %p1106_p0 }
  0x1a   : > { %p1114_p2 = pnand %p1113_p10, %p1107_p3 }
  0x1c   : > { %1117 = shalt.err (!%p1114_p2)
}
  0x1d   : > { %s1217_s25 = smov 128   ;;  %s1218_s26 = smov 8  }
  0x1e   : > { %1029 = dma.hbm_to_vmem [thread:$0]  (!%p1299_p11), %s1781_s1, 640, %s110_s19, [#allocation6], %s1217_s25, %s1217_s25, %s1218_s26  }
  0x1f   : > { %p24_p9 = scmp.eq.s32.totalorder %s23_s23, 0  ;;  %p33_p12 = scmp.ne.s32.totalorder %s1210_s11, %s1206_s10 }
  0x20   : > { %p34_p10 = scmp.eq.s32.totalorder %s1214_s12, 0  ;;  %p1039_p2 = scmp.lt.s32.totalorder %s1214_s12, 2 }
  0x21   : > { %s1321_s29 = scalar_select %p24_p9, %s1210_s11, %s26_s22  }
  0x22   : > { %p35_p13 = por %p34_p10, %p33_p12  ;;  %p1806_p0 = scmp.eq.s32.totalorder %s1271_s13, 1 }
  0x23   : > { %s123_s3 = sand.u32 1, %s1210_s11   ;;  %s1016_s4 = sshll.u32 %s1214_s12, 8 }
  0x24   : > { %p1325_p3 = por %p1806_p0, %p33_p12  ;;  %s964_s5 = sshll.u32 %s123_s3, 4 }
  0x25   : > { %s1334_s8 = scalar_lea.hbm %s1780_s0, %s1016_s4  ;;  %s127_s14 = scalar_lea.vmem [#allocation2], %s964_s5 }
  0x26   : > { %s1807_s30 = scalar_select %p1325_p3, 1, 0 }
  0x27   : > { %s135_s18 = sshll.u32 %s127_s14, 4  ;;  %p1336_p11 = pnand %p1039_p2, %p35_p13  ;;  %s136_s18 = int_to_ptr.vmem [resolvable:$true] %s135_s18 }
  0x28   : > { %s124_s20 = scalar_lea.sflag [#allocation3], %s123_s3  ;;  %s1118_s22 = scalar_lea.hbm %s1334_s8, 256 }
  0x29   : > { %p1119_p5 = scmp.ne.s32.totalorder %s1334_s8, %s1118_s22  ;;  %p1120_p7 = pneg %p1336_p11 }
  0x2a   : > { %s1123_s25 = scalar_lea.hbm %s1780_s0, 512  ;;  %p1124_p10 = scmp.lt.s32.totalorder %s1334_s8, %s1780_s0 }
  0x2b   : > { %p1121_p9 = pnand %p1120_p7, %p1119_p5  ;;  %p1125_p2 = scmp.lt.s32.totalorder %s1123_s25, %s1118_s22 }
  0x2d   : > { %p1122_p12 = pneg %p1121_p9  ;;  %p1126_p13 = por %p1125_p2, %p1124_p10 }
  0x2f   : > { %p1127_p0 = pnand %p1126_p13, %p1122_p12 }
  0x31   : > { %1130 = shalt.err (!%p1127_p0)
}
  0x32   : > { %s1131_s28 = scalar_lea.vmem %s136_s18, 256  ;;  %s1219_s3 = smov [#allocation2]  }
  0x33   : > { %p1132_p1 = scmp.ne.s32.totalorder %s136_s18, %s1131_s28  ;;  %s1136_s4 = sshll.u32 %s1219_s3, 4  ;;  %s1137_s4 = int_to_ptr.vmem [resolvable:$false] %s1136_s4 }
  0x34   : > { %s1138_s5 = scalar_lea.vmem %s1137_s4, 512  ;;  %p1139_p5 = scmp.lt.s32.totalorder %s136_s18, %s1137_s4 }
  0x35   : > { %p1134_p6 = pnand %p1132_p1, %p1120_p7  ;;  %p1140_p9 = scmp.lt.s32.totalorder %s1138_s5, %s1131_s28 }
  0x37   : > { %p1135_p3 = pneg %p1134_p6  ;;  %p1141_p4 = por %p1140_p9, %p1139_p5 }
  0x39   : > { %p1142_p8 = pnand %p1141_p4, %p1135_p3 }
  0x3b   : > { %1145 = shalt.err (!%p1142_p8)
}
  0x3c   : > { %1033 = dma.hbm_to_vmem [thread:$0]  (!%p1336_p11), %s1334_s8, 256, %s136_s18, %s124_s20  }
  0x3d   : > { %p1809_p12 = scmp.ne.s32.totalorder %s1804_s17, 0 }
  0x3e   : > { %s1357_s6 = sand.u32 (!%p1809_p12), 1, %s1206_s10   ;;  %p1810_p1 = scmp.ne.s32.totalorder (!%p1809_p12), %s1802_s15, 0 }
  0x3f   : > { %144 = sbr.rel (%p1809_p12) target bundleno = 802 (0x322), region = 28  ;;  %s968_s7 = sshll.u32 (!%p1809_p12), %s1357_s6, 4 }
  0x40   : > { %s147_s14 = scalar_lea.sflag (!%p1809_p12), [#allocation3], %s1357_s6  ;;  %s150_s22 = scalar_lea.vmem (!%p1809_p12), [#allocation2], %s968_s7 }
  0x44   : > { %1189 = dma.done.wait (%p1810_p1), %s147_s14, 256  }
  0x45   : > { %1191 = vsyncadd (%p1810_p1), %s147_s14, 4294967040  ;;  %p1811_p4 = scmp.eq.s32.totalorder %s1271_s13, 0 }
  0x47   : > { %1193 = dma.done.wait (%p1811_p4), [#allocation6], 640   ;;  %p1812_p6 = pmov %p1811_p4 }
  0x48   : > { %v1371_v0 = vld [vmem:[%s150_s22] sm:$0xff]  ;;  %s1220_s17 = smov 125   ;;  %s1221_s8 = smov 80   ;;  %v1377_v1 = vld [vmem:[%s150_s22 + $0x8] sm:$0xff]  ;;  %v1228_v2 = vmov 0.0   ;;  %v182_v3 = vlaneseq }
  0x49   : > { %1195 = vsyncadd (%p1812_p6), [#allocation6], 4294966656  ;;  %576 = vrot.lane.b32.xlu1 %v1371_v0, %s1220_s17  ;;  %370 = vrot.lane.b32.xlu0 %v1371_v0, %s1221_s8  ;;  %s1222_s15 = smov 96   ;;  %s1223_s18 = smov 126  }
  0x4a   : > { %s1224_s19 = smov 112   ;;  %s1225_s20 = smov 127   ;;  %451 = vmatprep.mubr.f32.mxu0 %v1228_v2  ;;  %651 = vmatprep.mubr.f32.mxu1 %v1228_v2  ;;  %v1425_v4 = vand.u32 127, %v182_v3 }
  0x4b   : > { %s1226_s23 = smov 16   ;;  %s1227_s24 = smov 1  }
  0x4c   : > { %s1229_s25 = smov 32   ;;  %s1230_s26 = smov 2   ;;  %v184_v5 = vadd.s32 128, %v1425_v4  ;;  %v1431_v7 = vand.u32 15, %v1425_v4  ;;  %vm374_vm0 = vcmp.lt.s32.totalorder %v1425_v4, 80  ;;  %vm527_vm1 = vcmp.lt.s32.totalorder %v1425_v4, 125 }
  0x4d   : > { %578 = vrot.lane.b32.xlu1 %v1377_v1, %s1220_s17  ;;  %372 = vrot.lane.b32.xlu0 %v1377_v1, %s1221_s8  ;;  %s1231_s27 = smov 48   ;;  %s1232_s28 = smov 3   ;;  %vm361_vm5 = vcmp.lt.s32.totalorder %v1425_v4, 96  ;;  %vm514_vm7 = vcmp.lt.s32.totalorder %v1425_v4, 126  ;;  %vm1788_vm10 = vcmp.lt.s32.totalorder %v1425_v4, 112  ;;  %vm1801_vm12 = vcmp.lt.s32.totalorder %v1425_v4, 127 }
  0x4e   : > { %v1428_v6 = vand.u32 15, %v184_v5  ;;  %v1433_v8 = vadd.s32 48, %v184_v5  ;;  %v1439_v12 = vadd.s32 3, %v1431_v7  ;;  %v1445_v13 = vadd.s32 32, %v184_v5  ;;  %s1017_s3 = sshll.u32 %s1271_s13, 8  ;;  %s174_s4 = scalar_lea.vmem [#allocation7], %s968_s7 }
  0x4f   : > { %v1468_v23 = vadd.s32 2, %v1431_v7  ;;  %v1478_v26 = vadd.s32 16, %v184_v5  ;;  %v1495_v34 = vadd.s32 1, %v1431_v7  ;;  %v1508_v39 = vadd.s32 4294967280, %v1425_v4  ;;  %s880_s5 = sshll.u32 %s174_s4, 4  ;;  %p1834_p3 = scmp.ne.s32.totalorder %s1807_s30, 0  ;;  %s881_s5 = int_to_ptr.vmem [resolvable:$true] %s880_s5 }
  0x50   : > { %v1436_v9 = vadd.s32 3, %v1428_v6  ;;  %vm294_vm2 = vcmp.lt.s32.totalorder %v1433_v8, 256  ;;  %vm301_vm4 = vcmp.lt.s32.totalorder %v1439_v12, 16  ;;  %vm278_vm6 = vcmp.lt.s32.totalorder %v1445_v13, 256  ;;  %s1234_s13 = smov [#allocation7]  }
  0x51   : > { %359 = vrot.lane.b32.xlu1 %v1377_v1, %s1222_s15  ;;  %357 = vrot.lane.b32.xlu0 %v1371_v0, %s1222_s15  ;;  %v1465_v20 = vadd.s32 2, %v1428_v6  ;;  %vm285_vm9 = vcmp.lt.s32.totalorder %v1468_v23, 16  ;;  %vm1787_vm11 = vcmp.lt.s32.totalorder %v1478_v26, 256  ;;  %v1492_v31 = vadd.s32 1, %v1428_v6 }
  0x52   : > { %vm302_vm3 = vcmp.lt.s32.totalorder %v1436_v9, 16  ;;  %vm1789_vm14 = vcmp.lt.s32.totalorder %v1495_v34, 16  ;;  %vm1792_vm15 = vcmp.lt.s32.totalorder %v1425_v4, 16  ;;  %v1521_v42 = vadd.s32 4294967295, %v1428_v6 }
  0x53   : > { %vm286_vm8 = vcmp.lt.s32.totalorder %v1465_v20, 16  ;;  %vm1790_vm13 = vcmp.lt.s32.totalorder %v1492_v31, 16  ;;  %v1526_v45 = vadd.s32 4294967295, %v1431_v7  ;;  %v1539_v50 = vadd.s32 4294967264, %v1425_v4 }
  0x54   : > { %v1551_v53 = vadd.s32 4294967294, %v1428_v6  ;;  %v1555_v56 = vadd.s32 4294967294, %v1431_v7  ;;  %v1567_v61 = vadd.s32 4294967248, %v1425_v4  ;;  %v1583_v5 = vadd.s32 4294967293, %v1431_v7 }
  0x55   : > { %570 = vrot.lane.b32.xlu1 %v1377_v1, %s1223_s18  ;;  %568 = vrot.lane.b32.xlu0 %v1371_v0, %s1223_s18 }
  0x59   : > { %346 = vrot.lane.b32.xlu1 %v1377_v1, %s1224_s19  ;;  %344 = vrot.lane.b32.xlu0 %v1371_v0, %s1224_s19 }
  0x5d   : > { %562 = vrot.lane.b32.xlu1 %v1377_v1, %s1225_s20  ;;  %560 = vrot.lane.b32.xlu0 %v1371_v0, %s1225_s20 }
  0x61   : > { %333 = vrot.lane.b32.xlu1 %v1377_v1, %s1226_s23  ;;  %331 = vrot.lane.b32.xlu0 %v1371_v0, %s1226_s23 }
  0x65   : > { %554 = vrot.lane.b32.xlu1 %v1377_v1, %s1227_s24  ;;  %552 = vrot.lane.b32.xlu0 %v1371_v0, %s1227_s24 }
  0x69   : > { %320 = vrot.lane.b32.xlu1 %v1377_v1, %s1229_s25  ;;  %318 = vrot.lane.b32.xlu0 %v1371_v0, %s1229_s25 }
  0x6d   : > { %546 = vrot.lane.b32.xlu1 %v1377_v1, %s1230_s26  ;;  %544 = vrot.lane.b32.xlu0 %v1371_v0, %s1230_s26 }
  0x71   : > { %307 = vrot.lane.b32.xlu1 %v1377_v1, %s1231_s27  ;;  %305 = vrot.lane.b32.xlu0 %v1371_v0, %s1231_s27 }
  0x75   : > { %538 = vrot.lane.b32.xlu1 %v1377_v1, %s1232_s28  ;;  %536 = vrot.lane.b32.xlu0 %v1371_v0, %s1232_s28 }
  0xbb   : > { %v577_v10 = vpop.permute.xlu1 %576  ;;  %v371_v11 = vpop.permute.xlu0 %370 }
  0xbf   : > { %v579_v14 = vpop.permute.xlu1 %578  ;;  %v373_v15 = vpop.permute.xlu0 %372 }
  0xc0   : > { %v376_v16 = vsel %vm374_vm0, %v373_v15, %v371_v11  ;;  %v581_v17 = vsel %vm527_vm1, %v579_v14, %v577_v10  ;;  %v375_v18 = vsel %vm374_vm0, %v371_v11, %v373_v15  ;;  %v580_v19 = vsel %vm527_vm1, %v577_v10, %v579_v14  ;;  %v177_v14 = vld [vmem:[#allocation5] sm:$0xff] }
  0xc1   : > { %971 = vmatprep.subr.msk.mxu0 %vm294_vm2, %v376_v16  ;;  %978 = vmatprep.subr.msk.mxu1 %vm302_vm3, %v581_v17  ;;  %v179_v17 = vld [vmem:[#allocation5 + $0x10] sm:$0xff] }
  0xc2   : > { %406 = vmatpush1.msra.mxu0 %v375_v18  ;;  %979 = vmatpush1.msk.msra.mxu1 %vm301_vm4, %v580_v19 }
  0xc3   : > { %v360_v21 = vpop.permute.xlu1 %359  ;;  %v358_v22 = vpop.permute.xlu0 %357 }
  0xc4   : > { %v363_v24 = vsel %vm361_vm5, %v360_v21, %v358_v22  ;;  %v362_v25 = vsel %vm361_vm5, %v358_v22, %v360_v21 }
  0xc5   : > { %972 = vmatprep.subr.msk.mxu0 %vm278_vm6, %v363_v24  ;;  %v181_v24 = vld [vmem:[#allocation5 + $0x20] sm:$0xff] }
  0xc6   : > { %408 = vmatpush1.msra.mxu0 %v362_v25 }
  0xc7   : > { %v571_v27 = vpop.permute.xlu1 %570  ;;  %v569_v28 = vpop.permute.xlu0 %568 }
  0xc8   : > { %v572_v29 = vsel %vm514_vm7, %v569_v28, %v571_v27  ;;  %v573_v30 = vsel %vm514_vm7, %v571_v27, %v569_v28 }
  0xc9   : > { %980 = vmatprep.subr.msk.mxu1 %vm286_vm8, %v573_v30 }
  0xca   : > { %981 = vmatpush1.msk.msra.mxu1 %vm285_vm9, %v572_v29 }
  0xcb   : > { %v347_v32 = vpop.permute.xlu1 %346  ;;  %v345_v33 = vpop.permute.xlu0 %344 }
  0xcc   : > { %v350_v35 = vsel %vm1788_vm10, %v347_v32, %v345_v33  ;;  %v349_v36 = vsel %vm1788_vm10, %v345_v33, %v347_v32  ;;  %vm1795_vm10 = vcmp.lt.s32.totalorder %v1425_v4, 1 }
  0xcd   : > { %973 = vmatprep.subr.msk.mxu0 %vm1787_vm11, %v350_v35  ;;  %vm1791_vm11 = vcmp.ge.s32.totalorder %v1508_v39, 0 }
  0xce   : > { %410 = vmatpush1.msra.mxu0 %v349_v36 }
  0xcf   : > { %v563_v37 = vpop.permute.xlu1 %562  ;;  %v561_v38 = vpop.permute.xlu0 %560  ;;  %411 = vmatprep.subr.mxu0 %v1377_v1 }
  0xd0   : > { %v564_v40 = vsel %vm1801_vm12, %v561_v38, %v563_v37  ;;  %v565_v41 = vsel %vm1801_vm12, %v563_v37, %v561_v38  ;;  %412 = vmatpush1.msra.mxu0 %v1371_v0  ;;  %vm219_vm12 = vcmp.ge.s32.totalorder %v1583_v5, 0 }
  0xd1   : > { %982 = vmatprep.subr.msk.mxu1 %vm1790_vm13, %v565_v41  ;;  %vm1794_vm13 = vcmp.ge.s32.totalorder %v1526_v45, 0 }
  0xd2   : > { %983 = vmatpush1.msk.msra.mxu1 %vm1789_vm14, %v564_v40  ;;  %vm1793_vm14 = vcmp.ge.s32.totalorder %v1521_v42, 0 }
  0xd3   : > { %v334_v43 = vpop.permute.xlu1 %333  ;;  %v332_v44 = vpop.permute.xlu0 %331  ;;  %611 = vmatprep.subr.mxu1 %v1377_v1 }
  0xd4   : > { %v337_v46 = vsel %vm1792_vm15, %v334_v43, %v332_v44  ;;  %v336_v47 = vsel %vm1792_vm15, %v332_v44, %v334_v43  ;;  %612 = vmatpush1.msra.mxu1 %v1371_v0  ;;  %vm1796_vm15 = vcmp.ge.s32.totalorder %v1539_v50, 0  ;;  %v1579_v0 = vadd.s32 4294967293, %v1428_v6 }
  0xd5   : > { %413 = vmatprep.subr.mxu0 %v336_v47 }
  0xd6   : > { %974 = vmatpush1.msk.msra.mxu0 %vm1791_vm11, %v337_v46  ;;  %vm1797_vm11 = vcmp.lt.s32.totalorder %v1425_v4, 32 }
  0xd7   : > { %v555_v48 = vpop.permute.xlu1 %554  ;;  %v553_v49 = vpop.permute.xlu0 %552 }
  0xd8   : > { %v556_v51 = vsel %vm1795_vm10, %v553_v49, %v555_v48  ;;  %v557_v52 = vsel %vm1795_vm10, %v555_v48, %v553_v49  ;;  %vm1799_vm10 = vcmp.ge.s32.totalorder %v1555_v56, 0 }
  0xd9   : > { %984 = vmatprep.subr.msk.mxu1 %vm1793_vm14, %v556_v51  ;;  %vm1800_vm14 = vcmp.lt.s32.totalorder %v1425_v4, 2 }
  0xda   : > { %985 = vmatpush1.msk.msra.mxu1 %vm1794_vm13, %v557_v52  ;;  %vm1798_vm13 = vcmp.ge.s32.totalorder %v1551_v53, 0 }
  0xdb   : > { %v321_v54 = vpop.permute.xlu1 %320  ;;  %v319_v55 = vpop.permute.xlu0 %318 }
  0xdc   : > { %v324_v57 = vsel %vm1797_vm11, %v321_v54, %v319_v55  ;;  %v323_v58 = vsel %vm1797_vm11, %v319_v55, %v321_v54  ;;  %vm211_vm11 = vcmp.ge.s32.totalorder %v1567_v61, 0 }
  0xdd   : > { %415 = vmatprep.subr.mxu0 %v323_v58 }
  0xde   : > { %975 = vmatpush1.msk.msra.mxu0 %vm1796_vm15, %v324_v57  ;;  %vm309_vm15 = vcmp.lt.s32.totalorder %v1425_v4, 48 }
  0xdf   : > { %v547_v59 = vpop.permute.xlu1 %546  ;;  %v545_v60 = vpop.permute.xlu0 %544 }
  0xe0   : > { %v548_v62 = vsel %vm1800_vm14, %v545_v60, %v547_v59  ;;  %v549_v63 = vsel %vm1800_vm14, %v547_v59, %v545_v60  ;;  %vm220_vm14 = vcmp.ge.s32.totalorder %v1579_v0, 0 }
  0xe1   : > { %986 = vmatprep.subr.msk.mxu1 %vm1798_vm13, %v548_v62  ;;  %vm383_vm13 = vcmask 457728  }
  0xe2   : > { %987 = vmatpush1.msk.msra.mxu1 %vm1799_vm10, %v549_v63  ;;  %vm462_vm10 = vcmp.lt.s32.totalorder %v1425_v4, 3 }
  0xe3   : > { %v308_v1 = vpop.permute.xlu1 %307  ;;  %v306_v3 = vpop.permute.xlu0 %305 }
  0xe4   : > { %v311_v10 = vsel %vm309_vm15, %v308_v1, %v306_v3  ;;  %v310_v11 = vsel %vm309_vm15, %v306_v3, %v308_v1  ;;  %v178_v3 = vld [vmem:[#allocation5 + $0x8] sm:$0xff] }
  0xe5   : > { %417 = vmatprep.subr.mxu0 %v310_v11 }
  0xe6   : > { %976 = vmatpush1.msk.msra.mxu0 %vm211_vm11, %v311_v10 }
  0xe7   : > { %v539_v6 = vpop.permute.xlu1 %538  ;;  %977 = vmatmul.mubr.msk.f32.vlgmr.msra.gmra.mxu0 %vm383_vm13, %v177_v14  ;;  %v537_v7 = vpop.permute.xlu0 %536 }
  0xe8   : > { %v540_v15 = vsel %vm462_vm10, %v537_v7, %v539_v6  ;;  %v541_v16 = vsel %vm462_vm10, %v539_v6, %v537_v7  ;;  %773 = vmatprep.mubr.f32.mxu0 %v1228_v2  ;;  %v180_v6 = vld [vmem:[#allocation5 + $0x18] sm:$0xff] }
  0xe9   : > { %988 = vmatprep.subr.msk.mxu1 %vm220_vm14, %v540_v15 }
  0xea   : > { %989 = vmatpush1.msk.msra.mxu1 %vm219_vm12, %v541_v16 }
  0xeb   : > { %990 = vmatmul.mubr.msk.f32.vlgmr.msra.gmra.mxu1 %vm383_vm13, %v179_v17 }
  0xec   : > { %847 = vmatprep.mubr.f32.mxu1 %v1228_v2  ;;  %v1233_v2 = vmov 0  }
  0xed   : > { %1091 = vset.pattern.permute.xlu0 %v1233_v2 }
 0x1a7   : > { %v1606_v18 = vpop.f32.mrf.mxu0 }
 0x1a8   : > { %523 = vrot.lane.b32.xlu0 %v1606_v18, %s1220_s17 }
 0x1a9   : > { %v455_v19 = vpop.f32.mrf.mxu0 }
 0x1aa   : > { %525 = vrot.lane.b32.xlu1 %v455_v19, %s1220_s17  ;;  %s878_s17 = scalar_lea.hbm %s1782_s2, %s1017_s3 }
 0x1ab   : > { %v1611_v21 = vpop.f32.mrf.mxu1 }
 0x1ac   : > { %698 = vrot.lane.b32.xlu0 %v1611_v21, %s1221_s8 }
 0x1ad   : > { %v1615_v22 = vpop.f32.mrf.mxu1 }
 0x1ae   : > { %700 = vrot.lane.b32.xlu1 %v1615_v22, %s1221_s8  ;;  %s866_s8 = scalar_lea.sflag [#allocation4], %s1357_s6 }
 0x1b0   : > { %510 = vrot.lane.b32.xlu0 %v1606_v18, %s1223_s18 }
 0x1b2   : > { %512 = vrot.lane.b32.xlu1 %v455_v19, %s1223_s18  ;;  %s1150_s18 = sshll.u32 %s1234_s13, 4  ;;  %s1151_s18 = int_to_ptr.vmem [resolvable:$false] %s1150_s18 }
 0x1b3   : > { %s1152_s7 = scalar_lea.vmem %s1151_s18, 512  ;;  %p1153_p10 = scmp.lt.s32.totalorder %s881_s5, %s1151_s18 }
 0x1b4   : > { %690 = vrot.lane.b32.xlu0 %v1611_v21, %s1222_s15 }
 0x1b6   : > { %692 = vrot.lane.b32.xlu1 %v1615_v22, %s1222_s15  ;;  %s1146_s15 = scalar_lea.vmem %s881_s5, 256 }
 0x1b7   : > { %p1147_p8 = scmp.ne.s32.totalorder %s881_s5, %s1146_s15  ;;  %p1154_p2 = scmp.lt.s32.totalorder %s1152_s7, %s1146_s15 }
 0x1b8   : > { %497 = vrot.lane.b32.xlu0 %v1606_v18, %s1225_s20 }
 0x1b9   : > { %p1148_p11 = pnand %p1147_p8, %p1834_p3  ;;  %p1155_p13 = por %p1154_p2, %p1153_p10 }
 0x1ba   : > { %499 = vrot.lane.b32.xlu1 %v455_v19, %s1225_s20 }
 0x1bb   : > { %p1149_p7 = pneg %p1148_p11 }
 0x1bc   : > { %682 = vrot.lane.b32.xlu0 %v1611_v21, %s1224_s19 }
 0x1bd   : > { %p1156_p0 = pnand %p1155_p13, %p1149_p7 }
 0x1be   : > { %684 = vrot.lane.b32.xlu1 %v1615_v22, %s1224_s19 }
 0x1c0   : > { %484 = vrot.lane.b32.xlu0 %v1606_v18, %s1227_s24 }
 0x1c2   : > { %486 = vrot.lane.b32.xlu1 %v455_v19, %s1227_s24 }
 0x1c4   : > { %674 = vrot.lane.b32.xlu0 %v1611_v21, %s1226_s23 }
 0x1c6   : > { %676 = vrot.lane.b32.xlu1 %v1615_v22, %s1226_s23 }
 0x1c8   : > { %471 = vrot.lane.b32.xlu0 %v1606_v18, %s1230_s26 }
 0x1ca   : > { %473 = vrot.lane.b32.xlu1 %v455_v19, %s1230_s26 }
 0x1cc   : > { %666 = vrot.lane.b32.xlu0 %v1611_v21, %s1229_s25 }
 0x1ce   : > { %668 = vrot.lane.b32.xlu1 %v1615_v22, %s1229_s25 }
 0x1d0   : > { %458 = vrot.lane.b32.xlu0 %v1606_v18, %s1232_s28 }
 0x1d2   : > { %460 = vrot.lane.b32.xlu1 %v455_v19, %s1232_s28 }
 0x1d4   : > { %658 = vrot.lane.b32.xlu0 %v1611_v21, %s1231_s27 }
 0x1d6   : > { %660 = vrot.lane.b32.xlu1 %v1615_v22, %s1231_s27 }
 0x1d8   : > { %856 = vperm.xlu0 %1091, %v181_v24  }
 0x21a   : > { %v524_v25 = vpop.permute.xlu0 %523 }
 0x21c   : > { %v526_v27 = vpop.permute.xlu1 %525 }
 0x21d   : > { %v528_v28 = vsel %vm527_vm1, %v524_v25, %v526_v27  ;;  %v529_v29 = vsel %vm527_vm1, %v526_v27, %v524_v25 }
 0x21e   : > { %998 = vmatprep.subr.msk.mxu1 %vm302_vm3, %v529_v29  ;;  %v699_v30 = vpop.permute.xlu0 %698  ;;  %vm1816_vm3 = vcmp.lt.s32.totalorder %v1495_v34, 16 }
 0x21f   : > { %999 = vmatpush1.msk.msra.mxu1 %vm301_vm4, %v528_v28  ;;  %vm1817_vm4 = vcmp.lt.s32.totalorder %v1425_v4, 112 }
 0x220   : > { %v701_v32 = vpop.permute.xlu1 %700 }
 0x221   : > { %v702_v33 = vsel %vm374_vm0, %v699_v30, %v701_v32  ;;  %v703_v35 = vsel %vm374_vm0, %v701_v32, %v699_v30  ;;  %vm1813_vm0 = vcmp.lt.s32.totalorder %v1425_v4, 127 }
 0x222   : > { %991 = vmatprep.subr.msk.mxu0 %vm294_vm2, %v703_v35  ;;  %v511_v36 = vpop.permute.xlu0 %510  ;;  %vm1814_vm1 = vmmov %vm1813_vm0  ;;  %vm1815_vm2 = vcmp.lt.s32.totalorder %v1492_v31, 16 }
 0x223   : > { %728 = vmatpush1.msra.mxu0 %v702_v33 }
 0x224   : > { %v513_v37 = vpop.permute.xlu1 %512 }
 0x225   : > { %v515_v9 = vsel %vm514_vm7, %v511_v36, %v513_v37  ;;  %v516_v12 = vsel %vm514_vm7, %v513_v37, %v511_v36  ;;  %vm1820_vm7 = vcmp.lt.s32.totalorder %v1425_v4, 1 }
 0x226   : > { %1000 = vmatprep.subr.msk.mxu1 %vm286_vm8, %v516_v12  ;;  %v691_v38 = vpop.permute.xlu0 %690  ;;  %vm1821_vm8 = vmmov %vm1820_vm7 }
 0x227   : > { %1001 = vmatpush1.msk.msra.mxu1 %vm285_vm9, %v515_v9  ;;  %vm1822_vm9 = vcmp.ge.s32.totalorder %v1521_v42, 0 }
 0x228   : > { %v693_v40 = vpop.permute.xlu1 %692 }
 0x229   : > { %v694_v8 = vsel %vm361_vm5, %v691_v38, %v693_v40  ;;  %v695_v41 = vsel %vm361_vm5, %v693_v40, %v691_v38  ;;  %vm1818_vm5 = vmmov %vm1817_vm4 }
 0x22a   : > { %992 = vmatprep.subr.msk.mxu0 %vm278_vm6, %v695_v41  ;;  %v498_v43 = vpop.permute.xlu0 %497  ;;  %vm1819_vm6 = vcmp.lt.s32.totalorder %v1478_v26, 256 }
 0x22b   : > { %730 = vmatpush1.msra.mxu0 %v694_v8 }
 0x22c   : > { %v500_v44 = vpop.permute.xlu1 %499 }
 0x22d   : > { %v502_v20 = vsel %vm1813_vm0, %v498_v43, %v500_v44  ;;  %v503_v23 = vsel %vm1814_vm1, %v500_v44, %v498_v43  ;;  %vm1823_vm0 = vcmp.ge.s32.totalorder %v1526_v45, 0  ;;  %vm1824_vm1 = vcmp.lt.s32.totalorder %v1425_v4, 16 }
 0x22e   : > { %1002 = vmatprep.subr.msk.mxu1 %vm1815_vm2, %v503_v23  ;;  %v683_v46 = vpop.permute.xlu0 %682  ;;  %vm1825_vm2 = vmmov %vm1824_vm1 }
 0x22f   : > { %1003 = vmatpush1.msk.msra.mxu1 %vm1816_vm3, %v502_v20  ;;  %vm1826_vm3 = vcmp.ge.s32.totalorder %v1508_v39, 0 }
 0x230   : > { %v685_v47 = vpop.permute.xlu1 %684  ;;  %807 = vmatprep.subr.mxu1 %v455_v19 }
 0x231   : > { %v686_v13 = vsel %vm1817_vm4, %v683_v46, %v685_v47  ;;  %v687_v48 = vsel %vm1818_vm5, %v685_v47, %v683_v46  ;;  %808 = vmatpush1.msra.mxu1 %v1606_v18  ;;  %vm1827_vm4 = vcmp.lt.s32.totalorder %v1425_v4, 2 }
 0x232   : > { %993 = vmatprep.subr.msk.mxu0 %vm1819_vm6, %v687_v48  ;;  %v485_v49 = vpop.permute.xlu0 %484  ;;  %vm1828_vm5 = vmmov %vm1827_vm4  ;;  %vm1829_vm6 = vcmp.ge.s32.totalorder %v1551_v53, 0 }
 0x233   : > { %732 = vmatpush1.msra.mxu0 %v686_v13 }
 0x234   : > { %v487_v31 = vpop.permute.xlu1 %486  ;;  %733 = vmatprep.subr.mxu0 %v1615_v22 }
 0x235   : > { %v489_v34 = vsel %vm1820_vm7, %v485_v49, %v487_v31  ;;  %v490_v51 = vsel %vm1821_vm8, %v487_v31, %v485_v49  ;;  %734 = vmatpush1.msra.mxu0 %v1611_v21  ;;  %vm1830_vm7 = vcmp.ge.s32.totalorder %v1555_v56, 0  ;;  %vm1831_vm8 = vcmp.lt.s32.totalorder %v1425_v4, 32 }
 0x236   : > { %1004 = vmatprep.subr.msk.mxu1 %vm1822_vm9, %v489_v34  ;;  %v675_v52 = vpop.permute.xlu0 %674  ;;  %vm1832_vm9 = vmmov %vm1831_vm8 }
 0x237   : > { %1005 = vmatpush1.msk.msra.mxu1 %vm1823_vm0, %v490_v51  ;;  %vm1833_vm0 = vcmp.ge.s32.totalorder %v1539_v50, 0 }
 0x238   : > { %v677_v26 = vpop.permute.xlu1 %676 }
 0x239   : > { %v679_v54 = vsel %vm1824_vm1, %v677_v26, %v675_v52  ;;  %v678_v55 = vsel %vm1825_vm2, %v675_v52, %v677_v26 }
 0x23a   : > { %735 = vmatprep.subr.mxu0 %v678_v55  ;;  %v472_v57 = vpop.permute.xlu0 %471 }
 0x23b   : > { %994 = vmatpush1.msk.msra.mxu0 %vm1826_vm3, %v679_v54 }
 0x23c   : > { %v474_v58 = vpop.permute.xlu1 %473 }
 0x23d   : > { %v476_v42 = vsel %vm1827_vm4, %v472_v57, %v474_v58  ;;  %v477_v45 = vsel %vm1828_vm5, %v474_v58, %v472_v57 }
 0x23e   : > { %1006 = vmatprep.subr.msk.mxu1 %vm1829_vm6, %v476_v42  ;;  %v667_v59 = vpop.permute.xlu0 %666 }
 0x23f   : > { %1007 = vmatpush1.msk.msra.mxu1 %vm1830_vm7, %v477_v45 }
 0x240   : > { %v669_v60 = vpop.permute.xlu1 %668 }
 0x241   : > { %v671_v62 = vsel %vm1831_vm8, %v669_v60, %v667_v59  ;;  %v670_v39 = vsel %vm1832_vm9, %v667_v59, %v669_v60 }
 0x242   : > { %737 = vmatprep.subr.mxu0 %v670_v39  ;;  %v459_v63 = vpop.permute.xlu0 %458 }
 0x243   : > { %995 = vmatpush1.msk.msra.mxu0 %vm1833_vm0, %v671_v62 }
 0x244   : > { %v461_v1 = vpop.permute.xlu1 %460 }
 0x245   : > { %v463_v53 = vsel %vm462_vm10, %v459_v63, %v461_v1  ;;  %v464_v56 = vsel %vm462_vm10, %v461_v1, %v459_v63 }
 0x246   : > { %1008 = vmatprep.subr.msk.mxu1 %vm220_vm14, %v463_v53  ;;  %v659_v10 = vpop.permute.xlu0 %658 }
 0x247   : > { %1009 = vmatpush1.msk.msra.mxu1 %vm219_vm12, %v464_v56 }
 0x248   : > { %v661_v11 = vpop.permute.xlu1 %660  ;;  %1010 = vmatmul.mubr.msk.f32.vlgmr.msra.gmra.mxu1 %vm383_vm13, %v178_v3 }
 0x249   : > { %v663_v50 = vsel %vm309_vm15, %v661_v11, %v659_v10  ;;  %v662_v14 = vsel %vm309_vm15, %v659_v10, %v661_v11 }
 0x24a   : > { %739 = vmatprep.subr.mxu0 %v662_v14 }
 0x24b   : > { %996 = vmatpush1.msk.msra.mxu0 %vm211_vm11, %v663_v50 }
 0x24c   : > { %997 = vmatmul.mubr.msk.f32.vlgmr.msra.gmra.mxu0 %vm383_vm13, %v180_v6 }
 0x253   : > { %v857_v7 = vpop.permute.xlu0 %856 }
 0x308   : > { %v849_v0 = vpop.f32.mrf.mxu1 }
 0x30a   : > { %v851_v16 = vpop.f32.mrf.mxu1 }
 0x30c   : > { %v775_v5 = vpop.f32.mrf.mxu0 }
 0x30d   : > { %v850_v15 = vadd.f32 %v849_v0, %v775_v5 }
 0x30e   : > { %v777_v17 = vpop.f32.mrf.mxu0 }
 0x30f   : > { %v852_v18 = vadd.f32 %v851_v16, %v777_v17  ;;  %v859_v19 = vadd.f32 %v857_v7, %v850_v15 }
 0x311   : > { %v860_v4 = vadd.f32 %v857_v7, %v852_v18  ;;  %v861_v21 = vmax.f32 %v859_v19, 0.0 }
 0x313   : > { %v862_v61 = vmax.f32 %v860_v4, 0.0  ;;  %863 = vst [vmem:[%s174_s4] sm:$0xff] %v861_v21 }
 0x315   : > { %864 = vst [vmem:[%s174_s4 + $0x8] sm:$0xff] %v862_v61 }
 0x316   : > { %1159 = shalt.err (!%p1156_p0)
}
 0x317   : > { %s1160_s19 = scalar_lea.hbm %s878_s17, 256  ;;  %s1164_s23 = scalar_lea.hbm %s1782_s2, 512 }
 0x318   : > { %p1161_p5 = scmp.ne.s32.totalorder %s878_s17, %s1160_s19  ;;  %p1165_p1 = scmp.lt.s32.totalorder %s878_s17, %s1782_s2 }
 0x319   : > { %p1166_p4 = scmp.lt.s32.totalorder %s1164_s23, %s1160_s19 }
 0x31a   : > { %p1162_p9 = pnand %p1161_p5, %p1834_p3 }
 0x31b   : > { %p1167_p6 = por %p1166_p4, %p1165_p1 }
 0x31c   : > { %p1163_p12 = pneg %p1162_p9 }
 0x31e   : > { %p1168_p8 = pnand %p1167_p6, %p1163_p12 }
 0x320   : > { %1171 = shalt.err (!%p1168_p8)
}
 0x321   : > { %1024 = dma.vmem_to_hbm [thread:$0]  (%p1834_p3), %s881_s5, 256, %s878_s17, %s866_s8  }
 0x322 PF: > { %s892_s26 = sand.u32 1, %s1202_s9   ;;  %p1835_p11 = scmp.ne.s32.totalorder %s1803_s16, 0 }
 0x323   : > { %p1836_p7 = scmp.ge.s32.totalorder %s1214_s12, 2  ;;  %s893_s27 = scalar_lea.sflag [#allocation4], %s892_s26 }
 0x325   : > { %p1035_p10 = pnand %p1836_p7, %p1835_p11 }
 0x327   : > { %p1036_p2 = pneg %p1035_p10 }
 0x329   : > { %1197 = dma.done.wait (%p1036_p2), %s893_s27, 256  }
 0x32a   : > { %1199 = vsyncadd (%p1036_p2), %s893_s27, 4294967040  ;;  %p16_p13 = scmp.ge.s32.totalorder %s1304_s21, 4   ;;  %s1837_s9 = smov %s1206_s10 }
 0x32b   : > { %s1838_s10 = smov %s1210_s11  ;;  %s1839_s11 = smov %s1321_s29 }
 0x32c   : > { %s1840_s12 = smov %s1304_s21  ;;  %18 = sbr.rel (!%p16_p13) target bundleno = 6 (0x6), region = 77 }
 0x331   :  { %898 = vsyncpa [#allocation3], 1 }
 0x332   :  { %900 = vsyncpa [#allocation3 + $0x1], 1 }
 0x333   :  { %901 = vsyncpa [#allocation6], 1 }
 0x334   :  { %902 = vsyncpa [#allocation4], 1 }
 0x335   :  { %904 = vsyncpa [#allocation4 + $0x1], 1 }

</bundles_post_ra>
